<compile_context>
chip_gen: v6e
topology: v6e:2x2x1
jax: 0.10.0
libtpu: 0.0.40
codegen_flags: <defaults>
</compile_context>

<pallas_src>
import functools

import jax
import jax.numpy as jnp
import numpy as np
from jax.experimental import pallas as pl
from jax.experimental.pallas import tpu as pltpu

LEAKY_SLOPE = 0.01              # nn.LeakyReLU default negative_slope (LeakyReLUConv2d)
LANE = 128                      # lane width: pad OC to a multiple of this
_ALIGN_M = 16                   # M-tile alignment, safe for bf16 and f32 tiles
_VMEM_BUDGET = 24 * 1024 * 1024  # tile-sizing budget; safe on v5e/v6e/v7x
_TM_CAP = 1024                  # measured sweet spot for streamed M tiles


def _round_up(x, m):
    return (x + m - 1) // m * m


# ----------------------------- Pallas kernel ------------------------------ #

def _gemm_bias_lrelu_kernel(x_ref, w_ref, b_ref, o_ref, *, slope, apply_act):
    # (TM, K) bf16 @ (K, OCp) bf16 on the MXU, f32 accumulation.
    acc = jnp.dot(x_ref[...], w_ref[...], preferred_element_type=jnp.float32)
    acc = acc + b_ref[...]                      # f32 bias add (VPU)
    if apply_act:
        acc = jnp.where(acc >= 0.0, acc, jnp.float32(slope) * acc)
    o_ref[...] = acc.astype(o_ref.dtype)


def _choose_tm(M, K, OCp, out_bytes):
    """Largest M tile fitting the VMEM budget (double-buffered in/out tiles,
    resident weights/bias), aligned to _ALIGN_M and capped at _TM_CAP."""
    resident = 2 * K * OCp * 2 + 2 * OCp * 4          # weights (bf16) + bias (f32)
    per_row = 2 * (K * 2 + OCp * out_bytes)           # 2 buffers x (patch row + out row)
    tm = (_VMEM_BUDGET - resident) // max(per_row, 1)
    tm = min(tm, _TM_CAP, _round_up(M, _ALIGN_M))
    tm = (tm // _ALIGN_M) * _ALIGN_M
    return max(tm, _ALIGN_M)


def _gemm_bias_lrelu(patches_bf16, w2d_bf16, b2d_f32, *, slope, apply_act, out_dtype):
    M, K = patches_bf16.shape
    Kw, OCp = w2d_bf16.shape
    assert K == Kw and OCp % LANE == 0
    out_bytes = np.dtype(out_dtype).itemsize

    TM = _choose_tm(M, K, OCp, out_bytes)
    Mp = _round_up(M, TM)
    if Mp != M:
        patches_bf16 = jnp.pad(patches_bf16, ((0, Mp - M), (0, 0)))

    # Explicit VMEM limit: double-buffered streaming tiles + resident weights.
    need = 2 * TM * K * 2 + 2 * TM * OCp * out_bytes + 2 * K * OCp * 2 + 2 * OCp * 4
    vmem_limit = int(min(max(need + (4 << 20), 16 << 20), 48 << 20))

    cost = pl.CostEstimate(
        flops=2 * Mp * K * OCp,
        transcendentals=0,
        bytes_accessed=Mp * K * 2 + K * OCp * 2 + OCp * 4 + Mp * OCp * out_bytes,
    )

    kernel = functools.partial(_gemm_bias_lrelu_kernel, slope=slope, apply_act=apply_act)
    out = pl.pallas_call(
        kernel,
        out_shape=jax.ShapeDtypeStruct((Mp, OCp), out_dtype),
        grid_spec=pltpu.PrefetchScalarGridSpec(
            num_scalar_prefetch=0,
            grid=(Mp // TM,),
            in_specs=[
                pl.BlockSpec((TM, K), lambda i: (i, 0)),     # streamed patches tile
                pl.BlockSpec((K, OCp), lambda i: (0, 0)),    # resident weights
                pl.BlockSpec((1, OCp), lambda i: (0, 0)),    # resident bias
            ],
            out_specs=pl.BlockSpec((TM, OCp), lambda i: (i, 0)),
        ),
        compiler_params=pltpu.CompilerParams(
            dimension_semantics=("parallel",),   # shard M tiles over v7x's 2 TCs
            vmem_limit_bytes=vmem_limit,
        ),
        cost_estimate=cost,
    )(patches_bf16, w2d_bf16, b2d_f32)

    return out[:M] if Mp != M else out


# ------------------------------ Conv wrapper ------------------------------ #

def conv2d_block(x_nhwc_bf16, layer, *, out_dtype):
    """PyTorch-semantics Conv2d (+ optional LeakyReLU) via im2col + Pallas GEMM."""
    N, H, W, C = x_nhwc_bf16.shape
    KH, KW, IC, OC = layer["KH"], layer["KW"], layer["IC"], layer["OC"]
    stride, padding = layer["stride"], layer["padding"]
    assert IC == C
    OH = (H + 2 * padding - KH) // stride + 1
    OW = (W + 2 * padding - KW) // stride + 1

    if KH == 1 and KW == 1 and stride == 1 and padding == 0:
        # 1x1 conv: no im2col needed, the GEMM reads the activations directly.
        patches = x_nhwc_bf16.reshape(N * OH * OW, C)
    else:
        # TODO(synk): fuse the stride-2 im2col window gather into the kernel
        # (needs manual DMA; BlockSpec cannot express strided window reads).
        xp = jnp.pad(x_nhwc_bf16,
                     ((0, 0), (padding, padding), (padding, padding), (0, 0)))
        cols = []
        for kh in range(KH):
            for kw in range(KW):
                cols.append(xp[:, kh:kh + stride * OH:stride,
                               kw:kw + stride * OW:stride, :])
        patches = jnp.stack(cols, axis=3)                    # (N, OH, OW, KH*KW, C)
        patches = patches.reshape(N * OH * OW, KH * KW * C)  # (M, K) bf16

    out = _gemm_bias_lrelu(patches, layer["w2d"], layer["b2d"],
                           slope=LEAKY_SLOPE, apply_act=layer["apply_act"],
                           out_dtype=out_dtype)
    out = out[:, :OC]                                        # drop lane padding
    return out.reshape(N, OH, OW, OC)


# --------------------------- Parameter creation ---------------------------- #

def _init_conv(key, oc, ic, kh, kw):
    kw_key, kb_key = jax.random.split(key)
    w = jax.random.normal(kw_key, (oc, ic, kh, kw), jnp.float32) * 0.05
    b = jax.random.normal(kb_key, (oc,), jnp.float32) * 0.01
    return w, b


def make_coco_shared_dis_params(key, *, ch, input_dim_a, input_dim_b, input_dim_c,
                                n_front_layer, n_shared_layer):
    """Raw layer lists of (w_oihw, b, stride, padding, apply_act), matching PyTorch."""
    del input_dim_c  # present in __init__ but unused by forward
    keys = iter(jax.random.split(key, 64))

    def make_front(input_dim):
        layers = []
        layers.append((*_init_conv(next(keys), ch, input_dim, 7, 7), 2, 3, True))
        tch = ch
        for _ in range(1, n_front_layer):
            layers.append((*_init_conv(next(keys), tch * 2, tch, 3, 3), 2, 1, True))
            tch *= 2
        if n_shared_layer == 0:
            layers.append((*_init_conv(next(keys), 1, tch, 1, 1), 1, 0, False))
        return layers, tch

    model_A, tch = make_front(input_dim_a)
    model_B, _ = make_front(input_dim_b)

    model_S = []
    if n_shared_layer > 0:
        stch = tch
        for _ in range(n_shared_layer):
            model_S.append((*_init_conv(next(keys), stch * 2, stch, 3, 3), 2, 1, True))
            stch *= 2
        model_S.append((*_init_conv(next(keys), 1, stch, 1, 1), 1, 0, False))

    return {"model_A": model_A, "model_B": model_B, "model_S": model_S}


def prepare_coco_shared_dis_params(params):
    """One-time re-layout: OIHW f32 -> (K, OC_pad) bf16 GEMM weights + f32 bias."""
    def prep_layer(w_oihw, b, stride, padding, apply_act):
        OC, IC, KH, KW = w_oihw.shape
        OCp = _round_up(OC, LANE)
        w2d = jnp.transpose(w_oihw, (2, 3, 1, 0)).reshape(KH * KW * IC, OC)
        w2d = jnp.pad(w2d, ((0, 0), (0, OCp - OC))).astype(jnp.bfloat16)
        b2d = jnp.pad(b.reshape(1, OC), ((0, 0), (0, OCp - OC))).astype(jnp.float32)
        return dict(w2d=w2d, b2d=b2d, stride=stride, padding=padding,
                    apply_act=apply_act, OC=OC, IC=IC, KH=KH, KW=KW)

    return {name: [prep_layer(*layer) for layer in layers]
            for name, layers in params.items()}


# -------------------------------- Forward ---------------------------------- #

def _run_layers(x_nhwc, layers):
    for layer in layers:
        # Activation layers store bf16 (halves HBM traffic); classifier stays f32.
        out_dtype = jnp.bfloat16 if layer["apply_act"] else jnp.float32
        x_nhwc = conv2d_block(x_nhwc, layer, out_dtype=out_dtype)
    return x_nhwc


def coco_shared_dis_forward(prepared, x_A_nchw, x_B_nchw):
    """Matches COCOSharedDis.forward: returns ([out_A.view(-1)], [out_B.view(-1)])."""
    x_A = jnp.transpose(x_A_nchw, (0, 2, 3, 1)).astype(jnp.bfloat16)  # NCHW -> NHWC
    x_B = jnp.transpose(x_B_nchw, (0, 2, 3, 1)).astype(jnp.bfloat16)

    feat_A = _run_layers(x_A, prepared["model_A"])
    feat_B = _run_layers(x_B, prepared["model_B"])

    if prepared["model_S"]:
        # Shared trunk: identical weights for A/B, run once on the concatenated batch.
        n_a = feat_A.shape[0]
        out = _run_layers(jnp.concatenate([feat_A, feat_B], axis=0), prepared["model_S"])
        out_A, out_B = out[:n_a], out[n_a:]
    else:
        out_A, out_B = feat_A, feat_B

    # Final conv has OC == 1, so NHWC flatten order equals PyTorch's NCHW .view(-1).
    return [out_A.reshape(-1)], [out_B.reshape(-1)]


# ------------------------------- Reference --------------------------------- #

def _reference_forward(params, x_A_nchw, x_B_nchw):
    """Pure-JAX reference (lax.conv) mirroring the bf16 storage of the kernel path."""
    def conv(x, w, b, stride, padding, act):
        w = w.astype(jnp.bfloat16).astype(jnp.float32)
        y = jax.lax.conv_general_dilated(
            x, w, window_strides=(stride, stride),
            padding=((padding, padding), (padding, padding)),
            dimension_numbers=("NCHW", "OIHW", "NCHW"))
        y = y + b.reshape(1, -1, 1, 1)
        if act:
            y = jnp.where(y >= 0.0, y, LEAKY_SLOPE * y)
            y = y.astype(jnp.bfloat16).astype(jnp.float32)
        return y

    def run(x, layers):
        for (w, b, s, p, act) in layers:
            x = conv(x, w, b, s, p, act)
        return x

    def branch(x, front):
        x = x.astype(jnp.bfloat16).astype(jnp.float32)
        x = run(x, front)
        x = run(x, params["model_S"])
        return x.reshape(-1)

    return branch(x_A_nchw, params["model_A"]), branch(x_B_nchw, params["model_B"])


# --------------------------------- Main ------------------------------------ #

if __name__ == "__main__":
    key = jax.random.PRNGKey(0)
    k_params, k_a, k_b = jax.random.split(key, 3)

    hp = dict(ch=8, input_dim_a=4, input_dim_b=4, input_dim_c=4,
              n_front_layer=2, n_shared_layer=1)
    params = make_coco_shared_dis_params(k_params, **hp)
    prepared = prepare_coco_shared_dis_params(params)

    # Small deterministic inputs (NCHW, as in PyTorch).
    x_A = jax.random.normal(k_a, (2, 4, 16, 16), jnp.float32)
    x_B = jax.random.normal(k_b, (2, 4, 16, 16), jnp.float32)

    forward = jax.jit(functools.partial(coco_shared_dis_forward, prepared))
    outs_A, outs_B = forward(x_A, x_B)
    jax.block_until_ready(outs_A[0])
    jax.block_until_ready(outs_B[0])

    # Sanity: 16 -> 8 -> 4 -> 2 spatial; final conv OC=1 => 2*2*2 = 8 logits each.
    assert outs_A[0].shape == (8,), outs_A[0].shape
    assert outs_B[0].shape == (8,), outs_B[0].shape

    # Numerical check against a pure-JAX conv reference (bf16-mirrored).
    ref_A, ref_B = _reference_forward(params, x_A, x_B)
    np.testing.assert_allclose(np.asarray(outs_A[0]), np.asarray(ref_A),
                               rtol=2e-2, atol=1e-3)
    np.testing.assert_allclose(np.asarray(outs_B[0]), np.asarray(ref_B),
                               rtol=2e-2, atol=1e-3)

    print("KERNEL_OK")
</pallas_src>

<mosaic_0001>
module attributes {stable_mosaic.version = 11 : i64} {
  func.func @_gemm_bias_lrelu_kernel(%arg0: i32, %arg1: memref<128x196xbf16, #tpu.memory_space<vmem>>, %arg2: memref<196x128xbf16, #tpu.memory_space<vmem>>, %arg3: memref<1x128xf32, #tpu.memory_space<vmem>>, %arg4: memref<128x128xbf16, #tpu.memory_space<vmem>>) attributes {dimension_semantics = [#tpu.dimension_semantics<parallel>], iteration_bounds = array<i64: 1>, scalar_prefetch = 0 : i64, scratch_operands = 0 : i64, tpu.core_type = #tpu.core_type<tc>, window_params = [{transform_indices = @transform_0, window_bounds = array<i64: 128, 196>}, {pipeline_mode = #tpu.pipeline_mode<synchronous>, transform_indices = @transform_1, window_bounds = array<i64: 196, 128>}, {pipeline_mode = #tpu.pipeline_mode<synchronous>, transform_indices = @transform_2, window_bounds = array<i64: 1, 128>}, {transform_indices = @transform_3, window_bounds = array<i64: 128, 128>}]} {
    %c0 = arith.constant 0 : index
    %c0_0 = arith.constant 0 : index
    %0 = vector.load %arg1[%c0, %c0_0] : memref<128x196xbf16, #tpu.memory_space<vmem>>, vector<128x196xbf16>
    %c0_1 = arith.constant 0 : index
    %c0_2 = arith.constant 0 : index
    %1 = vector.load %arg2[%c0_1, %c0_2] : memref<196x128xbf16, #tpu.memory_space<vmem>>, vector<196x128xbf16>
    %cst = arith.constant dense<0.000000e+00> : vector<128x128xf32>
    %2 = tpu.matmul %0, %1, %cst {dimension_numbers = #tpu.dot_dimension_numbers<[1], [0], [0], [1], [0, 0, 1, 1], [], []>} : vector<128x196xbf16>, vector<196x128xbf16>, vector<128x128xf32> -> vector<128x128xf32>
    %c0_3 = arith.constant 0 : index
    %c0_4 = arith.constant 0 : index
    %3 = vector.load %arg3[%c0_3, %c0_4] : memref<1x128xf32, #tpu.memory_space<vmem>>, vector<1x128xf32>
    %4 = vector.broadcast %3 : vector<1x128xf32> to vector<128x128xf32>
    %5 = arith.addf %2, %4 : vector<128x128xf32>
    %cst_5 = arith.constant 0.000000e+00 : f32
    %6 = vector.broadcast %cst_5 : f32 to vector<128x128xf32>
    %7 = arith.cmpf oge, %5, %6 : vector<128x128xf32>
    %cst_6 = arith.constant 0.00999999977 : f32
    %8 = vector.broadcast %cst_6 : f32 to vector<128x128xf32>
    %9 = arith.mulf %8, %5 : vector<128x128xf32>
    %10 = arith.select %7, %5, %9 : vector<128x128xi1>, vector<128x128xf32>
    %11 = arith.truncf %10 : vector<128x128xf32> to vector<128x128xbf16>
    %c0_7 = arith.constant 0 : index
    %c0_8 = arith.constant 0 : index
    %12 = vector.load %arg4[%c0_7, %c0_8] : memref<128x128xbf16, #tpu.memory_space<vmem>>, vector<128x128xbf16>
    tpu.vector_store %arg4[%c0_7, %c0_8], %11 {strides = array<i32>} : memref<128x128xbf16, #tpu.memory_space<vmem>>, vector<128x128xbf16>,
    return
  }
  func.func @transform_0(%arg0: i32) -> (i32, i32) {
    %c0_i32 = arith.constant 0 : i32
    %c0_i32_0 = arith.constant 0 : i32
    return %arg0, %c0_i32 : i32, i32
  }
  func.func @transform_1(%arg0: i32) -> (i32, i32) {
    %c0_i32 = arith.constant 0 : i32
    %c0_i32_0 = arith.constant 0 : i32
    %c0_i32_1 = arith.constant 0 : i32
    return %c0_i32, %c0_i32_0 : i32, i32
  }
  func.func @transform_2(%arg0: i32) -> (i32, i32) {
    %c0_i32 = arith.constant 0 : i32
    %c0_i32_0 = arith.constant 0 : i32
    %c0_i32_1 = arith.constant 0 : i32
    return %c0_i32, %c0_i32_0 : i32, i32
  }
  func.func @transform_3(%arg0: i32) -> (i32, i32) {
    %c0_i32 = arith.constant 0 : i32
    %c0_i32_0 = arith.constant 0 : i32
    return %arg0, %c0_i32 : i32, i32
  }
}

module attributes {stable_mosaic.version = 11 : i64} {
  func.func @_gemm_bias_lrelu_kernel(%arg0: i32, %arg1: memref<32x72xbf16, #tpu.memory_space<vmem>>, %arg2: memref<72x128xbf16, #tpu.memory_space<vmem>>, %arg3: memref<1x128xf32, #tpu.memory_space<vmem>>, %arg4: memref<32x128xbf16, #tpu.memory_space<vmem>>) attributes {dimension_semantics = [#tpu.dimension_semantics<parallel>], iteration_bounds = array<i64: 1>, scalar_prefetch = 0 : i64, scratch_operands = 0 : i64, tpu.core_type = #tpu.core_type<tc>, window_params = [{transform_indices = @transform_0, window_bounds = array<i64: 32, 72>}, {pipeline_mode = #tpu.pipeline_mode<synchronous>, transform_indices = @transform_1, window_bounds = array<i64: 72, 128>}, {pipeline_mode = #tpu.pipeline_mode<synchronous>, transform_indices = @transform_2, window_bounds = array<i64: 1, 128>}, {transform_indices = @transform_3, window_bounds = array<i64: 32, 128>}]} {
    %c0 = arith.constant 0 : index
    %c0_0 = arith.constant 0 : index
    %0 = vector.load %arg1[%c0, %c0_0] : memref<32x72xbf16, #tpu.memory_space<vmem>>, vector<32x72xbf16>
    %c0_1 = arith.constant 0 : index
    %c0_2 = arith.constant 0 : index
    %1 = vector.load %arg2[%c0_1, %c0_2] : memref<72x128xbf16, #tpu.memory_space<vmem>>, vector<72x128xbf16>
    %cst = arith.constant dense<0.000000e+00> : vector<32x128xf32>
    %2 = tpu.matmul %0, %1, %cst {dimension_numbers = #tpu.dot_dimension_numbers<[1], [0], [0], [1], [0, 0, 1, 1], [], []>} : vector<32x72xbf16>, vector<72x128xbf16>, vector<32x128xf32> -> vector<32x128xf32>
    %c0_3 = arith.constant 0 : index
    %c0_4 = arith.constant 0 : index
    %3 = vector.load %arg3[%c0_3, %c0_4] : memref<1x128xf32, #tpu.memory_space<vmem>>, vector<1x128xf32>
    %4 = vector.broadcast %3 : vector<1x128xf32> to vector<32x128xf32>
    %5 = arith.addf %2, %4 : vector<32x128xf32>
    %cst_5 = arith.constant 0.000000e+00 : f32
    %6 = vector.broadcast %cst_5 : f32 to vector<32x128xf32>
    %7 = arith.cmpf oge, %5, %6 : vector<32x128xf32>
    %cst_6 = arith.constant 0.00999999977 : f32
    %8 = vector.broadcast %cst_6 : f32 to vector<32x128xf32>
    %9 = arith.mulf %8, %5 : vector<32x128xf32>
    %10 = arith.select %7, %5, %9 : vector<32x128xi1>, vector<32x128xf32>
    %11 = arith.truncf %10 : vector<32x128xf32> to vector<32x128xbf16>
    %c0_7 = arith.constant 0 : index
    %c0_8 = arith.constant 0 : index
    %12 = vector.load %arg4[%c0_7, %c0_8] : memref<32x128xbf16, #tpu.memory_space<vmem>>, vector<32x128xbf16>
    tpu.vector_store %arg4[%c0_7, %c0_8], %11 {strides = array<i32>} : memref<32x128xbf16, #tpu.memory_space<vmem>>, vector<32x128xbf16>,
    return
  }
  func.func @transform_0(%arg0: i32) -> (i32, i32) {
    %c0_i32 = arith.constant 0 : i32
    %c0_i32_0 = arith.constant 0 : i32
    return %arg0, %c0_i32 : i32, i32
  }
  func.func @transform_1(%arg0: i32) -> (i32, i32) {
    %c0_i32 = arith.constant 0 : i32
    %c0_i32_0 = arith.constant 0 : i32
    %c0_i32_1 = arith.constant 0 : i32
    return %c0_i32, %c0_i32_0 : i32, i32
  }
  func.func @transform_2(%arg0: i32) -> (i32, i32) {
    %c0_i32 = arith.constant 0 : i32
    %c0_i32_0 = arith.constant 0 : i32
    %c0_i32_1 = arith.constant 0 : i32
    return %c0_i32, %c0_i32_0 : i32, i32
  }
  func.func @transform_3(%arg0: i32) -> (i32, i32) {
    %c0_i32 = arith.constant 0 : i32
    %c0_i32_0 = arith.constant 0 : i32
    return %arg0, %c0_i32 : i32, i32
  }
}

module attributes {stable_mosaic.version = 11 : i64} {
  func.func @_gemm_bias_lrelu_kernel(%arg0: i32, %arg1: memref<16x144xbf16, #tpu.memory_space<vmem>>, %arg2: memref<144x128xbf16, #tpu.memory_space<vmem>>, %arg3: memref<1x128xf32, #tpu.memory_space<vmem>>, %arg4: memref<16x128xbf16, #tpu.memory_space<vmem>>) attributes {dimension_semantics = [#tpu.dimension_semantics<parallel>], iteration_bounds = array<i64: 1>, scalar_prefetch = 0 : i64, scratch_operands = 0 : i64, tpu.core_type = #tpu.core_type<tc>, window_params = [{transform_indices = @transform_0, window_bounds = array<i64: 16, 144>}, {pipeline_mode = #tpu.pipeline_mode<synchronous>, transform_indices = @transform_1, window_bounds = array<i64: 144, 128>}, {pipeline_mode = #tpu.pipeline_mode<synchronous>, transform_indices = @transform_2, window_bounds = array<i64: 1, 128>}, {transform_indices = @transform_3, window_bounds = array<i64: 16, 128>}]} {
    %c0 = arith.constant 0 : index
    %c0_0 = arith.constant 0 : index
    %0 = vector.load %arg1[%c0, %c0_0] : memref<16x144xbf16, #tpu.memory_space<vmem>>, vector<16x144xbf16>
    %c0_1 = arith.constant 0 : index
    %c0_2 = arith.constant 0 : index
    %1 = vector.load %arg2[%c0_1, %c0_2] : memref<144x128xbf16, #tpu.memory_space<vmem>>, vector<144x128xbf16>
    %cst = arith.constant dense<0.000000e+00> : vector<16x128xf32>
    %2 = tpu.matmul %0, %1, %cst {dimension_numbers = #tpu.dot_dimension_numbers<[1], [0], [0], [1], [0, 0, 1, 1], [], []>} : vector<16x144xbf16>, vector<144x128xbf16>, vector<16x128xf32> -> vector<16x128xf32>
    %c0_3 = arith.constant 0 : index
    %c0_4 = arith.constant 0 : index
    %3 = vector.load %arg3[%c0_3, %c0_4] : memref<1x128xf32, #tpu.memory_space<vmem>>, vector<1x128xf32>
    %4 = vector.broadcast %3 : vector<1x128xf32> to vector<16x128xf32>
    %5 = arith.addf %2, %4 : vector<16x128xf32>
    %cst_5 = arith.constant 0.000000e+00 : f32
    %6 = vector.broadcast %cst_5 : f32 to vector<16x128xf32>
    %7 = arith.cmpf oge, %5, %6 : vector<16x128xf32>
    %cst_6 = arith.constant 0.00999999977 : f32
    %8 = vector.broadcast %cst_6 : f32 to vector<16x128xf32>
    %9 = arith.mulf %8, %5 : vector<16x128xf32>
    %10 = arith.select %7, %5, %9 : vector<16x128xi1>, vector<16x128xf32>
    %11 = arith.truncf %10 : vector<16x128xf32> to vector<16x128xbf16>
    %c0_7 = arith.constant 0 : index
    %c0_8 = arith.constant 0 : index
    %12 = vector.load %arg4[%c0_7, %c0_8] : memref<16x128xbf16, #tpu.memory_space<vmem>>, vector<16x128xbf16>
    tpu.vector_store %arg4[%c0_7, %c0_8], %11 {strides = array<i32>} : memref<16x128xbf16, #tpu.memory_space<vmem>>, vector<16x128xbf16>,
    return
  }
  func.func @transform_0(%arg0: i32) -> (i32, i32) {
    %c0_i32 = arith.constant 0 : i32
    %c0_i32_0 = arith.constant 0 : i32
    return %arg0, %c0_i32 : i32, i32
  }
  func.func @transform_1(%arg0: i32) -> (i32, i32) {
    %c0_i32 = arith.constant 0 : i32
    %c0_i32_0 = arith.constant 0 : i32
    %c0_i32_1 = arith.constant 0 : i32
    return %c0_i32, %c0_i32_0 : i32, i32
  }
  func.func @transform_2(%arg0: i32) -> (i32, i32) {
    %c0_i32 = arith.constant 0 : i32
    %c0_i32_0 = arith.constant 0 : i32
    %c0_i32_1 = arith.constant 0 : i32
    return %c0_i32, %c0_i32_0 : i32, i32
  }
  func.func @transform_3(%arg0: i32) -> (i32, i32) {
    %c0_i32 = arith.constant 0 : i32
    %c0_i32_0 = arith.constant 0 : i32
    return %arg0, %c0_i32 : i32, i32
  }
}

module attributes {stable_mosaic.version = 11 : i64} {
  func.func @_gemm_bias_lrelu_kernel(%arg0: i32, %arg1: memref<16x32xbf16, #tpu.memory_space<vmem>>, %arg2: memref<32x128xbf16, #tpu.memory_space<vmem>>, %arg3: memref<1x128xf32, #tpu.memory_space<vmem>>, %arg4: memref<16x128xf32, #tpu.memory_space<vmem>>) attributes {dimension_semantics = [#tpu.dimension_semantics<parallel>], iteration_bounds = array<i64: 1>, scalar_prefetch = 0 : i64, scratch_operands = 0 : i64, tpu.core_type = #tpu.core_type<tc>, window_params = [{transform_indices = @transform_0, window_bounds = array<i64: 16, 32>}, {pipeline_mode = #tpu.pipeline_mode<synchronous>, transform_indices = @transform_1, window_bounds = array<i64: 32, 128>}, {pipeline_mode = #tpu.pipeline_mode<synchronous>, transform_indices = @transform_2, window_bounds = array<i64: 1, 128>}, {transform_indices = @transform_3, window_bounds = array<i64: 16, 128>}]} {
    %c0 = arith.constant 0 : index
    %c0_0 = arith.constant 0 : index
    %0 = vector.load %arg1[%c0, %c0_0] : memref<16x32xbf16, #tpu.memory_space<vmem>>, vector<16x32xbf16>
    %c0_1 = arith.constant 0 : index
    %c0_2 = arith.constant 0 : index
    %1 = vector.load %arg2[%c0_1, %c0_2] : memref<32x128xbf16, #tpu.memory_space<vmem>>, vector<32x128xbf16>
    %cst = arith.constant dense<0.000000e+00> : vector<16x128xf32>
    %2 = tpu.matmul %0, %1, %cst {dimension_numbers = #tpu.dot_dimension_numbers<[1], [0], [0], [1], [0, 0, 1, 1], [], []>} : vector<16x32xbf16>, vector<32x128xbf16>, vector<16x128xf32> -> vector<16x128xf32>
    %c0_3 = arith.constant 0 : index
    %c0_4 = arith.constant 0 : index
    %3 = vector.load %arg3[%c0_3, %c0_4] : memref<1x128xf32, #tpu.memory_space<vmem>>, vector<1x128xf32>
    %4 = vector.broadcast %3 : vector<1x128xf32> to vector<16x128xf32>
    %5 = arith.addf %2, %4 : vector<16x128xf32>
    %c0_5 = arith.constant 0 : index
    %c0_6 = arith.constant 0 : index
    %6 = vector.load %arg4[%c0_5, %c0_6] : memref<16x128xf32, #tpu.memory_space<vmem>>, vector<16x128xf32>
    tpu.vector_store %arg4[%c0_5, %c0_6], %5 {strides = array<i32>} : memref<16x128xf32, #tpu.memory_space<vmem>>, vector<16x128xf32>,
    return
  }
  func.func @transform_0(%arg0: i32) -> (i32, i32) {
    %c0_i32 = arith.constant 0 : i32
    %c0_i32_0 = arith.constant 0 : i32
    return %arg0, %c0_i32 : i32, i32
  }
  func.func @transform_1(%arg0: i32) -> (i32, i32) {
    %c0_i32 = arith.constant 0 : i32
    %c0_i32_0 = arith.constant 0 : i32
    %c0_i32_1 = arith.constant 0 : i32
    return %c0_i32, %c0_i32_0 : i32, i32
  }
  func.func @transform_2(%arg0: i32) -> (i32, i32) {
    %c0_i32 = arith.constant 0 : i32
    %c0_i32_0 = arith.constant 0 : i32
    %c0_i32_1 = arith.constant 0 : i32
    return %c0_i32, %c0_i32_0 : i32, i32
  }
  func.func @transform_3(%arg0: i32) -> (i32, i32) {
    %c0_i32 = arith.constant 0 : i32
    %c0_i32_0 = arith.constant 0 : i32
    return %arg0, %c0_i32 : i32, i32
  }
}

</mosaic_0001>

<bundles_post_ra>
// kernel: coco_shared_dis_forward.6
= control target key start
LH: loop header
LB: loop body
LE: loop exit
PB: predicated region body
PF: predicated region fallthrough
CT: control target
= control target key end

     0   :  { %v649_v0 = vmov 0   ;;  %vm210_vm0 = vcmask 556032   ;;  %vm235_vm1 = vcmask 1041408   ;;  %s836_s1 = inlined_call_operand.vmem [shape: bf16[196,128], index: 1, kind: input, shape index: {}]   ;;  %s837_s0 = inlined_call_operand.vmem [shape: bf16[128,196], index: 0, kind: input, shape index: {}]   ;;  %s838_s2 = inlined_call_operand.vmem [shape: f32[1,128], index: 2, kind: input, shape index: {}]   ;;  %s839_s3 = inlined_call_operand.vmem [shape: bf16[128,128], index: 3, kind: output, shape index: {}]  }
   0x1   :  { %239 = vmatprep.subr.bf16.mxu0 %v649_v0  ;;  %585 = vmatprep.subr.bf16.mxu1 %v649_v0  ;;  %v612_v1 = vld [vmem:[%s836_s1 + $0x38] sm:$0xff]   ;;  %v613_v2 = vld [vmem:[%s836_s1 + $0x30] sm:$0xff]   ;;  %v614_v3 = vld [vmem:[%s836_s1 + $0x28] sm:$0xff]  }
   0x2   :  { %240 = vmatpush1.bf16.msra.mxu0 %v612_v1  ;;  %598 = vmatpush1.bf16.msra.mxu1 %v612_v1  ;;  %v615_v4 = vld [vmem:[%s836_s1 + $0x20] sm:$0xff]   ;;  %v616_v6 = vld [vmem:[%s836_s1 + $0x18] sm:$0xff]   ;;  %v617_v8 = vld [vmem:[%s836_s1 + $0x10] sm:$0xff]  }
   0x3   :  { %241 = vmatprep.subr.bf16.mxu0 %v649_v0  ;;  %586 = vmatprep.subr.bf16.mxu1 %v649_v0  ;;  %v627_v5 = vld [vmem:[%s837_s0 + $0x4] ss:$8 sps:$4 sm:$0xff]   ;;  %v620_v11 = vld [vmem:[%s836_s1 + $0x60] ss:$0 sps:$4 sm:$0x33]   ;;  %v621_v13 = vld [vmem:[%s836_s1 + $0x58] sm:$0xff]  }
   0x4   :  { %v630_v7 = vld [vmem:[%s837_s0 + $0x44] ss:$8 sps:$4 sm:$0xff]   ;;  %498 = vmatprep.mubr.msk.bf16.mxu0 %vm210_vm0, %v627_v5  ;;  %v237_v12 = vsel %vm235_vm1, %v620_v11, 0  ;;  %v622_v14 = vld [vmem:[%s836_s1 + $0x50] sm:$0xff]   ;;  %v625_v17 = vld [vmem:[%s837_s0] ss:$8 sps:$4 sm:$0xff]  }
   0x5   :  { %502 = vmatprep.mubr.msk.bf16.mxu1 %vm210_vm0, %v630_v7  ;;  %v618_v9 = vld [vmem:[%s836_s1 + $0x8] sm:$0xff]   ;;  %v619_v10 = vld [vmem:[%s836_s1] sm:$0xff]   ;;  %v631_v19 = vld [vmem:[%s837_s0 + $0x14] ss:$8 sps:$4 sm:$0xff]  }
   0x6   :  { %242 = vmatpush1.bf16.msra.mxu0 %v613_v2  ;;  %599 = vmatpush1.bf16.msra.mxu1 %v613_v2  ;;  %v623_v15 = vld [vmem:[%s836_s1 + $0x48] sm:$0xff]   ;;  %v624_v16 = vld [vmem:[%s836_s1 + $0x40] sm:$0xff]   ;;  %v633_v20 = vld [vmem:[%s837_s0 + $0x54] ss:$8 sps:$4 sm:$0xff]  }
   0x7   :  { %243 = vmatprep.subr.bf16.mxu0 %v649_v0  ;;  %587 = vmatprep.subr.bf16.mxu1 %v649_v0  ;;  %v628_v18 = vld [vmem:[%s837_s0 + $0x40] ss:$8 sps:$4 sm:$0xff]   ;;  %v635_v21 = vld [vmem:[%s837_s0 + $0x10] ss:$8 sps:$4 sm:$0xff]   ;;  %v637_v23 = vld [vmem:[%s837_s0 + $0x24] ss:$8 sps:$4 sm:$0xff]  }
   0x8   :  { %v636_v22 = vld [vmem:[%s837_s0 + $0x50] ss:$8 sps:$4 sm:$0xff]   ;;  %v639_v24 = vld [vmem:[%s837_s0 + $0x64] ss:$8 sps:$4 sm:$0xff]   ;;  %v641_v25 = vld [vmem:[%s837_s0 + $0x20] ss:$8 sps:$4 sm:$0xff]  }
   0x9   :  { %v642_v26 = vld [vmem:[%s837_s0 + $0x60] ss:$8 sps:$4 sm:$0xff]   ;;  %v643_v27 = vld [vmem:[%s837_s0 + $0x34] ss:$8 sps:$4 sm:$0xff]   ;;  %v647_v29 = vld [vmem:[%s837_s0 + $0x30] ss:$8 sps:$4 sm:$0xff]  }
   0xa   :  { %244 = vmatpush1.bf16.msra.mxu0 %v614_v3  ;;  %600 = vmatpush1.bf16.msra.mxu1 %v614_v3  ;;  %v645_v28 = vld [vmem:[%s837_s0 + $0x74] ss:$8 sps:$4 sm:$0xff]   ;;  %v648_v30 = vld [vmem:[%s837_s0 + $0x70] ss:$8 sps:$4 sm:$0xff]   ;;  %v794_v31 = vld [vmem:[%s838_s2] ss:$0 sm:$0xff] }
   0xb   :  { %245 = vmatprep.subr.bf16.mxu0 %v649_v0  ;;  %588 = vmatprep.subr.bf16.mxu1 %v649_v0 }
   0xe   :  { %246 = vmatpush1.bf16.msra.mxu0 %v615_v4  ;;  %601 = vmatpush1.bf16.msra.mxu1 %v615_v4 }
   0xf   :  { %247 = vmatprep.subr.bf16.mxu0 %v649_v0  ;;  %589 = vmatprep.subr.bf16.mxu1 %v649_v0 }
  0x12   :  { %248 = vmatpush1.bf16.msra.mxu0 %v616_v6  ;;  %602 = vmatpush1.bf16.msra.mxu1 %v616_v6 }
  0x13   :  { %249 = vmatprep.subr.bf16.mxu0 %v649_v0  ;;  %590 = vmatprep.subr.bf16.mxu1 %v649_v0 }
  0x16   :  { %250 = vmatpush1.bf16.msra.mxu0 %v617_v8  ;;  %603 = vmatpush1.bf16.msra.mxu1 %v617_v8 }
  0x17   :  { %251 = vmatprep.subr.bf16.mxu0 %v649_v0  ;;  %591 = vmatprep.subr.bf16.mxu1 %v649_v0 }
  0x1a   :  { %252 = vmatpush1.bf16.msra.mxu0 %v618_v9  ;;  %604 = vmatpush1.bf16.msra.mxu1 %v618_v9 }
  0x1b   :  { %253 = vmatprep.subr.bf16.mxu0 %v649_v0  ;;  %592 = vmatprep.subr.bf16.mxu1 %v649_v0 }
  0x1e   :  { %254 = vmatpush1.bf16.msra.mxu0 %v619_v10  ;;  %605 = vmatpush1.bf16.msra.mxu1 %v619_v10 }
  0x1f   :  { %261 = vmatprep.subr.bf16.mxu0 %v649_v0  ;;  %593 = vmatprep.subr.bf16.mxu1 %v649_v0 }
  0x22   :  { %262 = vmatpush2.bf16.msra.mxu0 %v237_v12  ;;  %606 = vmatpush2.bf16.msra.mxu1 %v237_v12 }
  0x23   :  { %263 = vmatprep.subr.bf16.mxu0 %v649_v0  ;;  %594 = vmatprep.subr.bf16.mxu1 %v649_v0 }
  0x26   :  { %264 = vmatpush2.bf16.msra.mxu0 %v621_v13  ;;  %607 = vmatpush2.bf16.msra.mxu1 %v621_v13 }
  0x27   :  { %265 = vmatprep.subr.bf16.mxu0 %v649_v0  ;;  %595 = vmatprep.subr.bf16.mxu1 %v649_v0 }
  0x2a   :  { %266 = vmatpush2.bf16.msra.mxu0 %v622_v14  ;;  %608 = vmatpush2.bf16.msra.mxu1 %v622_v14 }
  0x2b   :  { %267 = vmatprep.subr.bf16.mxu0 %v649_v0  ;;  %596 = vmatprep.subr.bf16.mxu1 %v649_v0 }
  0x2e   :  { %268 = vmatpush2.bf16.msra.mxu0 %v623_v15  ;;  %609 = vmatpush2.bf16.msra.mxu1 %v623_v15 }
  0x2f   :  { %269 = vmatprep.subr.bf16.mxu0 %v649_v0  ;;  %597 = vmatprep.subr.bf16.mxu1 %v649_v0 }
  0x32   :  { %270 = vmatpush2.bf16.msra.mxu0 %v624_v16  ;;  %610 = vmatpush2.bf16.msra.mxu1 %v624_v16 }
  0x35   :  { %272 = vmatmul.mubr.bf16.vlgmr.msra.gmra.mxu0 %v625_v17  ;;  %304 = vmatmul.mubr.bf16.vlgmr.msra.gmra.mxu1 %v628_v18 }
  0x36   :  { %499 = vmatprep.mubr.msk.bf16.mxu0 %vm210_vm0, %v631_v19  ;;  %503 = vmatprep.mubr.msk.bf16.mxu1 %vm210_vm0, %v633_v20 }
  0x3d   :  { %280 = vmatmul.mubr.bf16.gmra.mxu0 %v635_v21  ;;  %312 = vmatmul.mubr.bf16.gmra.mxu1 %v636_v22 }
  0x3e   :  { %500 = vmatprep.mubr.msk.bf16.mxu0 %vm210_vm0, %v637_v23  ;;  %504 = vmatprep.mubr.msk.bf16.mxu1 %vm210_vm0, %v639_v24 }
  0x45   :  { %288 = vmatmul.mubr.bf16.gmra.mxu0 %v641_v25  ;;  %320 = vmatmul.mubr.bf16.gmra.mxu1 %v642_v26 }
  0x46   :  { %501 = vmatprep.mubr.msk.bf16.mxu0 %vm210_vm0, %v643_v27  ;;  %505 = vmatprep.mubr.msk.bf16.mxu1 %vm210_vm0, %v645_v28 }
  0x4d   :  { %296 = vmatmul.mubr.bf16.gmra.mxu0 %v647_v29  ;;  %328 = vmatmul.mubr.bf16.gmra.mxu1 %v648_v30 }
  0xf5   :  { %v273_v32 = vpop.f32.mrf.mxu0  ;;  %v305_v33 = vpop.f32.mrf.mxu1 }
  0xf6   :  { %v274_v34 = vadd.f32 %v794_v31, %v273_v32  ;;  %v306_v35 = vadd.f32 %v794_v31, %v305_v33 }
  0xf7   :  { %v275_v36 = vpop.f32.mrf.mxu0  ;;  %v307_v37 = vpop.f32.mrf.mxu1 }
  0xf8   :  { %v352_v38 = vmul.f32 0.01, %v274_v34  ;;  %v360_v39 = vmul.f32 0.01, %v306_v35  ;;  %vm336_vm2 = vcmp.ge.f32.partialorder %v274_v34, 0.0  ;;  %vm344_vm3 = vcmp.ge.f32.partialorder %v306_v35, 0.0 }
  0xf9   :  { %v276_v40 = vpop.f32.mrf.mxu0  ;;  %v308_v41 = vpop.f32.mrf.mxu1 }
  0xfa   :  { %v277_v42 = vadd.f32 %v794_v31, %v276_v40  ;;  %v309_v43 = vadd.f32 %v794_v31, %v308_v41  ;;  %v368_v48 = vsel %vm336_vm2, %v274_v34, %v352_v38  ;;  %v376_v49 = vsel %vm344_vm3, %v306_v35, %v360_v39 }
  0xfb   :  { %v278_v44 = vpop.f32.mrf.mxu0  ;;  %v310_v45 = vpop.f32.mrf.mxu1 }
  0xfc   :  { %vm337_vm4 = vcmp.ge.f32.partialorder %v277_v42, 0.0  ;;  %v353_v46 = vmul.f32 0.01, %v277_v42  ;;  %vm345_vm5 = vcmp.ge.f32.partialorder %v309_v43, 0.0  ;;  %v361_v47 = vmul.f32 0.01, %v309_v43 }
  0xfd   :  { %v281_v50 = vpop.f32.mrf.mxu0  ;;  %v313_v51 = vpop.f32.mrf.mxu1 }
  0xfe   :  { %v369_v52 = vsel %vm337_vm4, %v277_v42, %v353_v46  ;;  %v377_v53 = vsel %vm345_vm5, %v309_v43, %v361_v47  ;;  %v282_v54 = vadd.f32 %v794_v31, %v281_v50  ;;  %v314_v55 = vadd.f32 %v794_v31, %v313_v51 }
  0xff   :  { %v541_v56 = vpack.c.bf16 %v369_v52, %v368_v48  ;;  %v561_v57 = vpack.c.bf16 %v377_v53, %v376_v49  ;;  %v283_v58 = vpop.f32.mrf.mxu0  ;;  %v315_v59 = vpop.f32.mrf.mxu1 }
 0x100   :  { %v354_v60 = vmul.f32 0.01, %v282_v54  ;;  %v362_v61 = vmul.f32 0.01, %v314_v55  ;;  %vm338_vm6 = vcmp.ge.f32.partialorder %v282_v54, 0.0  ;;  %vm346_vm7 = vcmp.ge.f32.partialorder %v314_v55, 0.0 }
 0x101   :  { %542 = vst [vmem:[%s839_s3] sm:$0xff] %v541_v56   ;;  %581 = vst [vmem:[%s839_s3 + $0x20] sm:$0xff] %v561_v57   ;;  %v284_v62 = vpop.f32.mrf.mxu0  ;;  %v316_v63 = vpop.f32.mrf.mxu1 }
 0x102   :  { %v285_v0 = vadd.f32 %v794_v31, %v284_v62  ;;  %v317_v1 = vadd.f32 %v794_v31, %v316_v63  ;;  %v370_v6 = vsel %vm338_vm6, %v282_v54, %v354_v60  ;;  %v378_v7 = vsel %vm346_vm7, %v314_v55, %v362_v61 }
 0x103   :  { %v286_v2 = vpop.f32.mrf.mxu0  ;;  %v318_v3 = vpop.f32.mrf.mxu1 }
 0x104   :  { %vm339_vm8 = vcmp.ge.f32.partialorder %v285_v0, 0.0  ;;  %v355_v4 = vmul.f32 0.01, %v285_v0  ;;  %vm347_vm9 = vcmp.ge.f32.partialorder %v317_v1, 0.0  ;;  %v363_v5 = vmul.f32 0.01, %v317_v1 }
 0x105   :  { %v289_v8 = vpop.f32.mrf.mxu0  ;;  %v321_v9 = vpop.f32.mrf.mxu1 }
 0x106   :  { %v371_v10 = vsel %vm339_vm8, %v285_v0, %v355_v4  ;;  %v379_v11 = vsel %vm347_vm9, %v317_v1, %v363_v5  ;;  %v290_v12 = vadd.f32 %v794_v31, %v289_v8  ;;  %v322_v13 = vadd.f32 %v794_v31, %v321_v9 }
 0x107   :  { %v546_v14 = vpack.c.bf16 %v371_v10, %v370_v6  ;;  %v566_v15 = vpack.c.bf16 %v379_v11, %v378_v7  ;;  %v291_v16 = vpop.f32.mrf.mxu0  ;;  %v323_v17 = vpop.f32.mrf.mxu1 }
 0x108   :  { %v356_v18 = vmul.f32 0.01, %v290_v12  ;;  %v364_v19 = vmul.f32 0.01, %v322_v13  ;;  %vm340_vm10 = vcmp.ge.f32.partialorder %v290_v12, 0.0  ;;  %vm348_vm11 = vcmp.ge.f32.partialorder %v322_v13, 0.0 }
 0x109   :  { %578 = vst [vmem:[%s839_s3 + $0x8] sm:$0xff] %v546_v14   ;;  %582 = vst [vmem:[%s839_s3 + $0x28] sm:$0xff] %v566_v15   ;;  %v292_v20 = vpop.f32.mrf.mxu0  ;;  %v324_v21 = vpop.f32.mrf.mxu1 }
 0x10a   :  { %v293_v22 = vadd.f32 %v794_v31, %v292_v20  ;;  %v325_v23 = vadd.f32 %v794_v31, %v324_v21  ;;  %v372_v28 = vsel %vm340_vm10, %v290_v12, %v356_v18  ;;  %v380_v29 = vsel %vm348_vm11, %v322_v13, %v364_v19 }
 0x10b   :  { %v294_v24 = vpop.f32.mrf.mxu0  ;;  %v326_v25 = vpop.f32.mrf.mxu1 }
 0x10c   :  { %vm341_vm12 = vcmp.ge.f32.partialorder %v293_v22, 0.0  ;;  %v357_v26 = vmul.f32 0.01, %v293_v22  ;;  %vm349_vm13 = vcmp.ge.f32.partialorder %v325_v23, 0.0  ;;  %v365_v27 = vmul.f32 0.01, %v325_v23 }
 0x10d   :  { %v297_v30 = vpop.f32.mrf.mxu0  ;;  %v329_v32 = vpop.f32.mrf.mxu1 }
 0x10e   :  { %v373_v33 = vsel %vm341_vm12, %v293_v22, %v357_v26  ;;  %v381_v34 = vsel %vm349_vm13, %v325_v23, %v365_v27  ;;  %v298_v35 = vadd.f32 %v794_v31, %v297_v30  ;;  %v330_v36 = vadd.f32 %v794_v31, %v329_v32 }
 0x10f   :  { %v551_v37 = vpack.c.bf16 %v373_v33, %v372_v28  ;;  %v571_v38 = vpack.c.bf16 %v381_v34, %v380_v29  ;;  %v299_v39 = vpop.f32.mrf.mxu0  ;;  %v331_v40 = vpop.f32.mrf.mxu1 }
 0x110   :  { %v358_v43 = vmul.f32 0.01, %v298_v35  ;;  %v366_v44 = vmul.f32 0.01, %v330_v36  ;;  %vm342_vm14 = vcmp.ge.f32.partialorder %v298_v35, 0.0  ;;  %vm350_vm15 = vcmp.ge.f32.partialorder %v330_v36, 0.0 }
 0x111   :  { %579 = vst [vmem:[%s839_s3 + $0x10] sm:$0xff] %v551_v37   ;;  %583 = vst [vmem:[%s839_s3 + $0x30] sm:$0xff] %v571_v38   ;;  %v300_v41 = vpop.f32.mrf.mxu0  ;;  %v332_v42 = vpop.f32.mrf.mxu1 }
 0x112   :  { %v301_v45 = vadd.f32 %v794_v31, %v300_v41  ;;  %v333_v46 = vadd.f32 %v794_v31, %v332_v42  ;;  %v374_v51 = vsel %vm342_vm14, %v298_v35, %v358_v43  ;;  %v382_v52 = vsel %vm350_vm15, %v330_v36, %v366_v44 }
 0x113   :  { %v302_v47 = vpop.f32.mrf.mxu0  ;;  %v334_v48 = vpop.f32.mrf.mxu1 }
 0x114   :  { %vm343_vm0 = vcmp.ge.f32.partialorder %v301_v45, 0.0  ;;  %v359_v49 = vmul.f32 0.01, %v301_v45  ;;  %vm351_vm1 = vcmp.ge.f32.partialorder %v333_v46, 0.0  ;;  %v367_v50 = vmul.f32 0.01, %v333_v46 }
 0x116   :  { %v375_v53 = vsel %vm343_vm0, %v301_v45, %v359_v49  ;;  %v383_v54 = vsel %vm351_vm1, %v333_v46, %v367_v50 }
 0x117   :  { %v556_v55 = vpack.c.bf16 %v375_v53, %v374_v51  ;;  %v576_v56 = vpack.c.bf16 %v383_v54, %v382_v52 }
 0x119   :  { %580 = vst [vmem:[%s839_s3 + $0x18] sm:$0xff] %v556_v55   ;;  %584 = vst [vmem:[%s839_s3 + $0x38] sm:$0xff] %v576_v56  }

// kernel: coco_shared_dis_forward.7
= control target key start
LH: loop header
LB: loop body
LE: loop exit
PB: predicated region body
PF: predicated region fallthrough
CT: control target
= control target key end

     0   :  { %vm79_vm0 = vcmask 1043456   ;;  %vm72_vm1 = vcmask 588800   ;;  %s276_s1 = inlined_call_operand.vmem [shape: bf16[72,128], index: 1, kind: input, shape index: {}]   ;;  %s277_s0 = inlined_call_operand.vmem [shape: bf16[32,72], index: 0, kind: input, shape index: {}]   ;;  %s278_s2 = inlined_call_operand.vmem [shape: f32[1,128], index: 2, kind: input, shape index: {}]   ;;  %s279_s3 = inlined_call_operand.vmem [shape: bf16[32,128], index: 3, kind: output, shape index: {}]  }
   0x1   :  { %v219_v0 = vld [vmem:[%s276_s1 + $0x20] ss:$0 sps:$4 sm:$0xff]   ;;  %v220_v1 = vld [vmem:[%s276_s1 + $0x18] sm:$0xff]   ;;  %v221_v3 = vld [vmem:[%s276_s1 + $0x10] sm:$0xff]  }
   0x2   :  { %218 = vmatprep.subr.msk.bf16.mxu0 %vm79_vm0, %v219_v0  ;;  %v81_v2 = vsel %vm79_vm0, %v219_v0, 0  ;;  %v224_v4 = vld [vmem:[%s277_s0] sm:$0xff]   ;;  %v222_v5 = vld [vmem:[%s276_s1 + $0x8] sm:$0xff]  }
   0x3   :  { %205 = vmatpush3.bf16.msra.mxu0 %v81_v2  ;;  %214 = vmatprep.mubr.msk.bf16.mxu0 %vm72_vm1, %v224_v4  ;;  %v223_v6 = vld [vmem:[%s276_s1] sm:$0xff]   ;;  %v225_v7 = vld [vmem:[%s277_s0 + $0x8] sm:$0xff]  }
   0x4   :  { %206 = vmatprep.subr.bf16.mxu0 %v220_v1  ;;  %v168_v8 = vld [vmem:[%s278_s2] ss:$0 sm:$0xff] }
   0x7   :  { %207 = vmatpush3.bf16.msra.mxu0 %v220_v1 }
   0x8   :  { %208 = vmatprep.subr.bf16.mxu0 %v221_v3 }
   0xb   :  { %209 = vmatpush3.bf16.msra.mxu0 %v221_v3 }
   0xc   :  { %210 = vmatprep.subr.bf16.mxu0 %v222_v5 }
   0xf   :  { %211 = vmatpush3.bf16.msra.mxu0 %v222_v5 }
  0x10   :  { %212 = vmatprep.subr.bf16.mxu0 %v223_v6 }
  0x13   :  { %213 = vmatpush3.bf16.msra.mxu0 %v223_v6 }
  0x16   :  { %215 = vmatmul.mubr.msk.bf16.vlgmr.msra.gmra.mxu0 %vm72_vm1, %v225_v7 }
  0xd6   :  { %v216_v9 = vpop.f32.mrf.mxu0 }
  0xd7   :  { %v126_v10 = vadd.f32 %v216_v9, %v168_v8 }
  0xd8   :  { %v117_v11 = vpop.f32.mrf.mxu0 }
  0xd9   :  { %v118_v12 = vadd.f32 %v168_v8, %v117_v11  ;;  %v138_v14 = vmul.f32 0.01, %v126_v10  ;;  %vm134_vm2 = vcmp.ge.f32.partialorder %v126_v10, 0.0 }
  0xda   :  { %v217_v13 = vpop.f32.mrf.mxu0 }
  0xdb   :  { %v129_v15 = vadd.f32 %v217_v13, %v168_v8  ;;  %v136_v17 = vmul.f32 0.01, %v118_v12  ;;  %vm132_vm4 = vcmp.ge.f32.partialorder %v118_v12, 0.0  ;;  %v142_v20 = vsel %vm134_vm2, %v126_v10, %v138_v14 }
  0xdc   :  { %v120_v16 = vpop.f32.mrf.mxu0 }
  0xdd   :  { %vm135_vm3 = vcmp.ge.f32.partialorder %v129_v15, 0.0  ;;  %v139_v18 = vmul.f32 0.01, %v129_v15  ;;  %v121_v19 = vadd.f32 %v168_v8, %v120_v16  ;;  %v140_v24 = vsel %vm132_vm4, %v118_v12, %v136_v17 }
  0xdf   :  { %v143_v21 = vsel %vm135_vm3, %v129_v15, %v139_v18  ;;  %vm133_vm5 = vcmp.ge.f32.partialorder %v121_v19, 0.0  ;;  %v137_v22 = vmul.f32 0.01, %v121_v19 }
  0xe0   :  { %v194_v23 = vpack.c.bf16 %v143_v21, %v142_v20 }
  0xe1   :  { %v141_v25 = vsel %vm133_vm5, %v121_v19, %v137_v22 }
  0xe2   :  { %196 = vst [vmem:[%s279_s3 + $0x8] sm:$0xff] %v194_v23   ;;  %v189_v26 = vpack.c.bf16 %v141_v25, %v140_v24 }
  0xe4   :  { %190 = vst [vmem:[%s279_s3] sm:$0xff] %v189_v26  }

// kernel: coco_shared_dis_forward.11
= control target key start
LH: loop header
LB: loop body
LE: loop exit
PB: predicated region body
PF: predicated region fallthrough
CT: control target
= control target key end

     0   :  { %v117_v0 = vmov 0.0   ;;  %vm118_vm0 = vmmov 0   ;;  %vm45_vm1 = vcmask 261120   ;;  %s157_s1 = inlined_call_operand.vmem [shape: bf16[32,128], index: 1, kind: input, shape index: {}]   ;;  %s158_s0 = inlined_call_operand.vmem [shape: bf16[16,32], index: 0, kind: input, shape index: {}]   ;;  %s159_s2 = inlined_call_operand.vmem [shape: f32[1,128], index: 2, kind: input, shape index: {}]   ;;  %s160_s3 = inlined_call_operand.vmem [shape: f32[16,128], index: 3, kind: output, shape index: {}]  }
   0x1   :  { %104 = vmatprep.subr.bf16.mxu0 %v117_v0  ;;  %v114_v1 = vld [vmem:[%s157_s1 + $0x8] sm:$0xff]   ;;  %108 = vmatprep.mubr.msk.bf16.mxu0 %vm118_vm0, %v117_v0  ;;  %v115_v2 = vld [vmem:[%s157_s1] sm:$0xff]  }
   0x2   :  { %105 = vmatpush3.bf16.msra.mxu0 %v114_v1  ;;  %v116_v3 = vld [vmem:[%s158_s0] sm:$0xff]  }
   0x3   :  { %106 = vmatprep.subr.bf16.mxu0 %v117_v0  ;;  %v96_v4 = vld [vmem:[%s159_s2] ss:$0 sm:$0xff] }
   0x6   :  { %107 = vmatpush3.bf16.msra.mxu0 %v115_v2 }
   0x9   :  { %109 = vmatmul.mubr.msk.bf16.vlgmr.msra.gmra.mxu0 %vm45_vm1, %v116_v3 }
  0xc9   :  { %v83_v5 = vpop.f32.mrf.mxu0 }
  0xca   :  { %v84_v6 = vadd.f32 %v96_v4, %v83_v5 }
  0xcb   :  { %v110_v7 = vpop.f32.mrf.mxu0 }
  0xcc   :  { %90 = vst [vmem:[%s160_s3] sm:$0xff] %v84_v6 }
  0xcd   :  { %v86_v8 = vpop.f32.mrf.mxu0 }
  0xce   :  { %v87_v9 = vadd.f32 %v96_v4, %v86_v8 }
  0xcf   :  { %v111_v10 = vpop.f32.mrf.mxu0 }
  0xd0   :  { %91 = vst [vmem:[%s160_s3 + $0x8] sm:$0xff] %v87_v9 }

// kernel: coco_shared_dis_forward.10
= control target key start
LH: loop header
LB: loop body
LE: loop exit
PB: predicated region body
PF: predicated region fallthrough
CT: control target
= control target key end

     0   :  { %v205_v0 = vmov 0   ;;  %vm105_vm0 = vcmask 130048   ;;  %s265_s1 = inlined_call_operand.vmem [shape: bf16[144,128], index: 1, kind: input, shape index: {}]   ;;  %s266_s0 = inlined_call_operand.vmem [shape: bf16[16,144], index: 0, kind: input, shape index: {}]   ;;  %s267_s2 = inlined_call_operand.vmem [shape: f32[1,128], index: 2, kind: input, shape index: {}]   ;;  %s268_s3 = inlined_call_operand.vmem [shape: bf16[16,128], index: 3, kind: output, shape index: {}]  }
   0x1   :  { %109 = vmatprep.subr.bf16.mxu0 %v205_v0  ;;  %v193_v1 = vld [vmem:[%s265_s1 + $0x38] sm:$0xff]   ;;  %v194_v2 = vld [vmem:[%s265_s1 + $0x30] sm:$0xff]   ;;  %v195_v3 = vld [vmem:[%s265_s1 + $0x28] sm:$0xff]  }
   0x2   :  { %110 = vmatpush1.bf16.msra.mxu0 %v193_v1  ;;  %v196_v4 = vld [vmem:[%s265_s1 + $0x20] sm:$0xff]   ;;  %v197_v6 = vld [vmem:[%s265_s1 + $0x18] sm:$0xff]   ;;  %v198_v7 = vld [vmem:[%s265_s1 + $0x10] sm:$0xff]  }
   0x3   :  { %111 = vmatprep.subr.bf16.mxu0 %v205_v0  ;;  %v204_v5 = vld [vmem:[%s266_s0 + $0x4] ss:$8 sps:$4 sm:$0xff]   ;;  %v202_v11 = vld [vmem:[%s266_s0] ss:$8 sps:$4 sm:$0xff]  }
   0x4   :  { %182 = vmatprep.mubr.msk.bf16.mxu0 %vm105_vm0, %v204_v5  ;;  %v199_v8 = vld [vmem:[%s265_s1 + $0x8] sm:$0xff]   ;;  %v200_v9 = vld [vmem:[%s265_s1] sm:$0xff]  }
   0x5   :  { %v201_v10 = vld [vmem:[%s265_s1 + $0x40] sm:$0xff]  }
   0x6   :  { %112 = vmatpush1.bf16.msra.mxu0 %v194_v2  ;;  %v170_v12 = vld [vmem:[%s267_s2] ss:$0 sm:$0xff] }
   0x7   :  { %113 = vmatprep.subr.bf16.mxu0 %v205_v0 }
   0xa   :  { %114 = vmatpush1.bf16.msra.mxu0 %v195_v3 }
   0xb   :  { %115 = vmatprep.subr.bf16.mxu0 %v205_v0 }
   0xe   :  { %116 = vmatpush1.bf16.msra.mxu0 %v196_v4 }
   0xf   :  { %117 = vmatprep.subr.bf16.mxu0 %v205_v0 }
  0x12   :  { %118 = vmatpush1.bf16.msra.mxu0 %v197_v6 }
  0x13   :  { %119 = vmatprep.subr.bf16.mxu0 %v205_v0 }
  0x16   :  { %120 = vmatpush1.bf16.msra.mxu0 %v198_v7 }
  0x17   :  { %121 = vmatprep.subr.bf16.mxu0 %v205_v0 }
  0x1a   :  { %122 = vmatpush1.bf16.msra.mxu0 %v199_v8 }
  0x1b   :  { %123 = vmatprep.subr.bf16.mxu0 %v205_v0 }
  0x1e   :  { %124 = vmatpush1.bf16.msra.mxu0 %v200_v9 }
  0x1f   :  { %139 = vmatprep.subr.bf16.mxu0 %v205_v0 }
  0x22   :  { %140 = vmatpush2.bf16.msra.mxu0 %v201_v10 }
  0x25   :  { %142 = vmatmul.mubr.bf16.vlgmr.msra.gmra.mxu0 %v202_v11 }
  0xe5   :  { %v143_v13 = vpop.f32.mrf.mxu0 }
  0xe6   :  { %v144_v14 = vadd.f32 %v170_v12, %v143_v13 }
  0xe7   :  { %v145_v15 = vpop.f32.mrf.mxu0 }
  0xe8   :  { %v152_v17 = vmul.f32 0.01, %v144_v14  ;;  %vm150_vm1 = vcmp.ge.f32.partialorder %v144_v14, 0.0 }
  0xe9   :  { %v146_v16 = vpop.f32.mrf.mxu0 }
  0xea   :  { %v147_v18 = vadd.f32 %v170_v12, %v146_v16  ;;  %v154_v21 = vsel %vm150_vm1, %v144_v14, %v152_v17 }
  0xeb   :  { %v148_v19 = vpop.f32.mrf.mxu0 }
  0xec   :  { %vm151_vm2 = vcmp.ge.f32.partialorder %v147_v18, 0.0  ;;  %v153_v20 = vmul.f32 0.01, %v147_v18 }
  0xee   :  { %v155_v22 = vsel %vm151_vm2, %v147_v18, %v153_v20 }
  0xef   :  { %v190_v23 = vpack.c.bf16 %v155_v22, %v154_v21 }
  0xf1   :  { %191 = vst [vmem:[%s268_s3] sm:$0xff] %v190_v23  }

</bundles_post_ra>
